<compile_context>
chip_gen: v7x
topology: tpu7x:2x2x1
jax: 0.10.0
libtpu: 0.0.40
codegen_flags: <defaults>
</compile_context>

<pallas_src>
import jax
import jax.numpy as jnp
from jax.experimental import pallas as pl
from jax.experimental.pallas import tpu as pltpu


def _conv1x1_kernel_single_k(x_ref, w_ref, b_ref, o_ref):
    # x_ref: (Cin, thw)   input tile, pixels on the lane axis
    # w_ref: (Cout, Cin)  full weight (small channel counts)
    # b_ref: (Cout, 1)    bias, f32
    # o_ref: (Cout, thw)  lane-dense output tile
    acc = jnp.dot(w_ref[...], x_ref[...], preferred_element_type=jnp.float32)
    o_ref[...] = (acc + b_ref[...]).astype(o_ref.dtype)


def _conv1x1_kernel_multi_k(x_ref, w_ref, b_ref, o_ref, acc_ref):
    # x_ref: (tk, thw), w_ref: (Cout, tk), b_ref: (Cout, 1)
    # acc_ref: (Cout, thw) f32 accumulator carried over the K (Cin) grid axis.
    k = pl.program_id(2)

    @pl.when(k == 0)
    def _():
        acc_ref[...] = jnp.zeros_like(acc_ref)

    acc_ref[...] += jnp.dot(w_ref[...], x_ref[...],
                            preferred_element_type=jnp.float32)

    @pl.when(k == pl.num_programs(2) - 1)
    def _():
        # Bias added once in the finalize branch (not per K step).
        o_ref[...] = (acc_ref[...] + b_ref[...]).astype(o_ref.dtype)


def _pick_tk(cin, tile_k):
    """Cin tile: full Cin if small, else the largest multiple of 128 <= tile_k
    that exactly divides Cin (exact divisibility is required on the reduction
    axis -- OOB padding there would pollute valid outputs); fall back to full
    Cin otherwise."""
    if cin <= tile_k:
        return cin
    hi = tile_k - tile_k % 128
    for cand in range(hi, 127, -128):
        if cin % cand == 0:
            return cand
    return cin


def conv_connector(x_nchw, weight, bias_o, *, tile_hw=2048, tile_k=512,
                   vmem_budget_bytes=24 * 1024 * 1024):
    """ConvConnector.forward: 1x1 Conv2d with bias.

    x_nchw: (N, C_in, H, W)
    weight: (C_out, C_in) or PyTorch layout (C_out, C_in, 1, 1)
    bias_o: (C_out,)
    returns: (N, C_out, H, W) in x's dtype.
    """
    N, Cin, H, W = x_nchw.shape
    if weight.ndim == 4:                              # (Cout, Cin, 1, 1)
        weight = weight.reshape(weight.shape[0], weight.shape[1])
    Cout, Cin_w = weight.shape
    assert Cin_w == Cin, "weight/input channel mismatch"
    HW = H * W
    dtype = x_nchw.dtype
    itemsize = jnp.dtype(dtype).itemsize

    # Channels stay the contraction axis; pixels go to the lane axis.
    # This reshape is free (no transpose, no HBM rewrite).
    x3d = x_nchw.reshape(N, Cin, HW)
    w = weight.astype(dtype)                          # (Cout, Cin)
    b = bias_o.astype(jnp.float32).reshape(Cout, 1)   # f32 for accumulation

    # ---- Cin (reduction) tiling -------------------------------------------
    tk = _pick_tk(Cin, tile_k)
    k_tiles = Cin // tk

    # ---- spatial (lane) tiling: lane-dense, sized against a VMEM budget ----
    # double-buffered x/out streams + f32 accumulator, per lane column:
    per_col_bytes = (2 * tk + 2 * Cout) * itemsize + Cout * 4
    max_thw = max(128, (vmem_budget_bytes // per_col_bytes) // 128 * 128)
    thw = min(tile_hw, max_thw)
    hw_one_tile = pl.cdiv(HW, 128) * 128
    if hw_one_tile <= thw:              # small spatial extent -> single tile
        thw = hw_one_tile
    # Single image with a large spatial extent: split into >=2 parallel tiles
    # so dual-TensorCore parts (v7x) use both cores; each half stays >=512
    # lanes so per-step efficiency on single-core parts is unchanged.
    if N == 1 and HW >= 1024 and pl.cdiv(HW, thw) == 1:
        thw = max(512, pl.cdiv(pl.cdiv(HW, 2), 128) * 128)
    s_tiles = pl.cdiv(HW, thw)          # ragged edge handled by Pallas masking

    # ---- advisory cost + explicit VMEM limit --------------------------------
    cost = pl.CostEstimate(
        flops=2 * N * HW * Cin * Cout,
        transcendentals=0,
        bytes_accessed=(N * Cin * HW + N * Cout * HW + Cout * Cin) * itemsize
        + Cout * 4,
    )
    vmem_est = ((2 * thw * tk + 2 * thw * Cout + 2 * Cout * tk) * itemsize
                + Cout * thw * 4 + 2 * Cout * 4)
    vmem_limit = int(min(max(2 * vmem_est, 32 * 1024 * 1024),
                         64 * 1024 * 1024))

    if k_tiles == 1:
        kernel = _conv1x1_kernel_single_k
        dim_sem = ("parallel", "parallel")
        grid_spec = pltpu.PrefetchScalarGridSpec(
            num_scalar_prefetch=0,
            grid=(N, s_tiles),
            in_specs=[
                pl.BlockSpec((None, Cin, thw), lambda n, s: (n, 0, s)),
                pl.BlockSpec((Cout, Cin), lambda n, s: (0, 0)),
                pl.BlockSpec((Cout, 1), lambda n, s: (0, 0)),
            ],
            out_specs=pl.BlockSpec((None, Cout, thw), lambda n, s: (n, 0, s)),
        )
    else:
        kernel = _conv1x1_kernel_multi_k
        dim_sem = ("parallel", "parallel", "arbitrary")
        grid_spec = pltpu.PrefetchScalarGridSpec(
            num_scalar_prefetch=0,
            grid=(N, s_tiles, k_tiles),
            in_specs=[
                pl.BlockSpec((None, tk, thw), lambda n, s, k: (n, k, s)),
                pl.BlockSpec((Cout, tk), lambda n, s, k: (0, k)),
                pl.BlockSpec((Cout, 1), lambda n, s, k: (0, 0)),
            ],
            out_specs=pl.BlockSpec((None, Cout, thw),
                                   lambda n, s, k: (n, 0, s)),
            scratch_shapes=[pltpu.VMEM((Cout, thw), jnp.float32)],
        )

    out3d = pl.pallas_call(
        kernel,
        out_shape=jax.ShapeDtypeStruct((N, Cout, HW), dtype),
        grid_spec=grid_spec,
        compiler_params=pltpu.CompilerParams(
            dimension_semantics=dim_sem,
            vmem_limit_bytes=vmem_limit),
        cost_estimate=cost,
    )(x3d, w, b)

    return out3d.reshape(N, Cout, H, W)


if __name__ == "__main__":
    key = jax.random.PRNGKey(0)

    def _ref(x, w, b):
        return jnp.einsum("nchw,oc->nohw", x, w) + b[None, :, None, None]

    # 1) Small ConvConnector-like shape (N=2, Cin=4, Cout=8, 16x16 spatial).
    k1, k2, k3, key = jax.random.split(key, 4)
    x = jax.random.normal(k1, (2, 4, 16, 16), dtype=jnp.float32)
    w = jax.random.normal(k2, (8, 4), dtype=jnp.float32) * 0.1
    b = jax.random.normal(k3, (8,), dtype=jnp.float32) * 0.1
    out = jax.block_until_ready(conv_connector(x, w, b))
    assert out.shape == (2, 8, 16, 16)
    assert jnp.allclose(out, _ref(x, w, b), atol=1e-5, rtol=1e-5)

    # 2) Odd spatial extent (7x9=63) -> exercises ragged-edge masked stores.
    k1, k2, k3, key = jax.random.split(key, 4)
    x = jax.random.normal(k1, (1, 4, 7, 9), dtype=jnp.float32)
    w = jax.random.normal(k2, (8, 4), dtype=jnp.float32) * 0.1
    b = jax.random.normal(k3, (8,), dtype=jnp.float32) * 0.1
    out = jax.block_until_ready(conv_connector(x, w, b))
    assert out.shape == (1, 8, 7, 9)
    assert jnp.allclose(out, _ref(x, w, b), atol=1e-5, rtol=1e-5)

    # 3) Larger Cin with a forced small K tile -> exercises the accumulator
    #    (multi-K) path with the f32 VMEM scratch.
    k1, k2, k3, key = jax.random.split(key, 4)
    x = jax.random.normal(k1, (1, 256, 8, 8), dtype=jnp.float32)
    w = jax.random.normal(k2, (8, 256), dtype=jnp.float32) * 0.05
    b = jax.random.normal(k3, (8,), dtype=jnp.float32) * 0.1
    out = jax.block_until_ready(conv_connector(x, w, b, tile_k=128))
    assert out.shape == (1, 8, 8, 8)
    assert jnp.allclose(out, _ref(x, w, b), atol=1e-4, rtol=1e-4)

    # 4) PyTorch-style 4D weight (Cout, Cin, 1, 1) is accepted directly.
    k1, k2, k3, key = jax.random.split(key, 4)
    x = jax.random.normal(k1, (2, 4, 8, 8), dtype=jnp.float32)
    w4 = jax.random.normal(k2, (8, 4, 1, 1), dtype=jnp.float32) * 0.1
    b = jax.random.normal(k3, (8,), dtype=jnp.float32) * 0.1
    out = jax.block_until_ready(conv_connector(x, w4, b))
    assert out.shape == (2, 8, 8, 8)
    assert jnp.allclose(out, _ref(x, w4[:, :, 0, 0], b), atol=1e-5, rtol=1e-5)

    print("KERNEL_OK")
</pallas_src>

<mosaic_0001>
module attributes {stable_mosaic.version = 11 : i64} {
  func.func @_conv1x1_kernel_single_k(%arg0: i32, %arg1: i32, %arg2: memref<1x4x256xf32, #tpu.memory_space<vmem>>, %arg3: memref<8x4xf32, #tpu.memory_space<vmem>>, %arg4: memref<8x1xf32, #tpu.memory_space<vmem>>, %arg5: memref<1x8x256xf32, #tpu.memory_space<vmem>>) attributes {dimension_semantics = [#tpu.dimension_semantics<parallel>, #tpu.dimension_semantics<parallel>], iteration_bounds = array<i64: 2, 1>, scalar_prefetch = 0 : i64, scratch_operands = 0 : i64, tpu.core_type = #tpu.core_type<tc>, window_params = [{transform_indices = @transform_0, window_bounds = array<i64: 1, 4, 256>}, {pipeline_mode = #tpu.pipeline_mode<synchronous>, transform_indices = @transform_1, window_bounds = array<i64: 8, 4>}, {pipeline_mode = #tpu.pipeline_mode<synchronous>, transform_indices = @transform_2, window_bounds = array<i64: 8, 1>}, {transform_indices = @transform_3, window_bounds = array<i64: 1, 8, 256>}]} {
    %c0 = arith.constant 0 : index
    %c0_0 = arith.constant 0 : index
    %0 = vector.load %arg3[%c0, %c0_0] : memref<8x4xf32, #tpu.memory_space<vmem>>, vector<8x4xf32>
    %c0_1 = arith.constant 0 : index
    %c0_2 = arith.constant 0 : index
    %c0_3 = arith.constant 0 : index
    %1 = vector.load %arg2[%c0_1, %c0_2, %c0_3] : memref<1x4x256xf32, #tpu.memory_space<vmem>>, vector<1x4x256xf32>
    %2 = vector.shape_cast %1 : vector<1x4x256xf32> to vector<4x256xf32>
    %cst = arith.constant dense<0.000000e+00> : vector<8x256xf32>
    %3 = tpu.matmul %0, %2, %cst {dimension_numbers = #tpu.dot_dimension_numbers<[1], [0], [0], [1], [0, 0, 1, 1], [], []>} : vector<8x4xf32>, vector<4x256xf32>, vector<8x256xf32> -> vector<8x256xf32>
    %c0_4 = arith.constant 0 : index
    %c0_5 = arith.constant 0 : index
    %4 = vector.load %arg4[%c0_4, %c0_5] : memref<8x1xf32, #tpu.memory_space<vmem>>, vector<8x1xf32>
    %5 = vector.broadcast %4 : vector<8x1xf32> to vector<8x256xf32>
    %6 = arith.addf %3, %5 : vector<8x256xf32>
    %c0_6 = arith.constant 0 : index
    %c0_7 = arith.constant 0 : index
    %c0_8 = arith.constant 0 : index
    %7 = vector.load %arg5[%c0_6, %c0_7, %c0_8] : memref<1x8x256xf32, #tpu.memory_space<vmem>>, vector<1x8x256xf32>
    %8 = vector.shape_cast %7 : vector<1x8x256xf32> to vector<8x256xf32>
    %9 = vector.shape_cast %6 : vector<8x256xf32> to vector<1x8x256xf32>
    tpu.vector_store %arg5[%c0_6, %c0_7, %c0_8], %9 {strides = array<i32>} : memref<1x8x256xf32, #tpu.memory_space<vmem>>, vector<1x8x256xf32>,
    return
  }
  func.func @transform_0(%arg0: i32, %arg1: i32) -> (i32, i32, i32) {
    %c0_i32 = arith.constant 0 : i32
    %c0_i32_0 = arith.constant 0 : i32
    return %arg0, %c0_i32, %arg1 : i32, i32, i32
  }
  func.func @transform_1(%arg0: i32, %arg1: i32) -> (i32, i32) {
    %c0_i32 = arith.constant 0 : i32
    %c0_i32_0 = arith.constant 0 : i32
    %c0_i32_1 = arith.constant 0 : i32
    return %c0_i32, %c0_i32_0 : i32, i32
  }
  func.func @transform_2(%arg0: i32, %arg1: i32) -> (i32, i32) {
    %c0_i32 = arith.constant 0 : i32
    %c0_i32_0 = arith.constant 0 : i32
    %c0_i32_1 = arith.constant 0 : i32
    return %c0_i32, %c0_i32_0 : i32, i32
  }
  func.func @transform_3(%arg0: i32, %arg1: i32) -> (i32, i32, i32) {
    %c0_i32 = arith.constant 0 : i32
    %c0_i32_0 = arith.constant 0 : i32
    return %arg0, %c0_i32, %arg1 : i32, i32, i32
  }
}

</mosaic_0001>

<bundles_post_ra>
// kernel: tpu_custom_call.1
= control target key start
LH: loop header
LB: loop body
LE: loop exit
PB: predicated region body
PF: predicated region fallthrough
CT: control target
= control target key end

     0   :  { %8 = vsyncpa [#allocation3], 0  ;;  %s683_s0 = inlined_call_operand.vmem [shape: f32[2,4,256], index: 0, kind: input, shape index: {}]   ;;  %s684_s1 = inlined_call_operand.vmem [shape: f32[8,4], index: 1, kind: input, shape index: {}]   ;;  %s685_s2 = inlined_call_operand.vmem [shape: f32[8,1], index: 2, kind: input, shape index: {}]   ;;  %s686_s3 = inlined_call_operand.hbm [shape: f32[2,8,256], index: 3, kind: output, shape index: {}]  }
   0x1   :  { %10 = vsyncpa [#allocation3 + $0x1], 0  ;;  %s565_s12 = smov 0   ;;  %s567_s13 = smov 0  }
   0x2   :  { %s569_s14 = smov 0   ;;  %s571_s15 = smov 0  }
   0x3   :  { %s573_s16 = smov 0   ;;  %s575_s17 = smov 0  }
   0x4 LB: > { %s385_s18 = sadd.s32 4294967295, %s540_s17   ;;  %s386_s19 = sadd.s32 4294967294, %s540_s17   ;;  %s540_s17 = sphi %s575_s17, %s16_s17   ;;  %s536_s16 = sphi %s573_s16, %s693_s16   ;;  %s532_s15 = sphi %s571_s15, %s692_s15   ;;  %s528_s14 = sphi %s569_s14, %s691_s14   ;;  %s524_s13 = sphi %s567_s13, %s690_s13   ;;  %s520_s12 = sphi %s565_s12, %s689_s12  }
   0x5   : > { %s28_s20 = sadd.s32 1, %s536_s16  ;;  %s107_s21 = sadd.s32 1, %s528_s14 }
   0x6   : > { %p30_p0 = scmp.ge.s32.totalorder %s28_s20, 2  ;;  %p117_p1 = scmp.ne.s32.totalorder %s528_s14, %s524_s13 }
   0x7   : > { %p118_p2 = scmp.eq.s32.totalorder %s385_s18, 1  ;;  %p123_p3 = scmp.ne.s32.totalorder %s524_s13, %s520_s12 }
   0x8   : > { %s695_s20 = smov (%p30_p0, %s28_s20), 0  ;;  %p124_p5 = scmp.eq.s32.totalorder %s386_s19, 1 }
   0x9   : > { %p605_p4 = por %p118_p2, %p117_p1  ;;  %s102_s23 = ssub.s32 %s536_s16, %s695_s20 }
   0xa   : > { %p389_p6 = scmp.ge.s32.totalorder %s540_s17, 1  ;;  %p105_p7 = scmp.eq.s32.totalorder %s102_s23, 0 }
   0xb   : > { %p612_p8 = por %p124_p5, %p123_p3  ;;  %p161_p9 = scmp.lt.s32.totalorder %s540_s17, 3 }
   0xc   : > { %s618_s25 = scalar_select %p105_p7, %s528_s14, %s107_s21  }
   0xd   : > { %p162_p10 = pnand %p389_p6, %p161_p9 }
   0xe   : > { %p190_p11 = scmp.lt.s32.totalorder (!%p162_p10), %s532_s15, 1  ;;  %v542_v0 = vmov (!%p162_p10), 0.0   ;;  %v543_v1 = vmov (!%p162_p10), 0   ;;  %v202_v2 = vld [vmem:[%s685_s2] sm:$0xff] (!%p162_p10)  ;;  %vm214_vm0 = vcmask (!%p162_p10), 1043456   ;;  %vm210_vm1 = vcmask (!%p162_p10), 31744  }
   0xf   : > { %165 = sbr.rel (%p162_p10) target bundleno = 260 (0x104), region = 32  ;;  %283 = vmatprep.mubr.f32.mxu0 (!%p162_p10), %v542_v0  ;;  %460 = vset.pattern.permute.xlu0 (!%p162_p10), %v543_v1  ;;  %v200_v5 = vld [vmem:[%s684_s1] sm:$0xff] (!%p162_p10)  ;;  %s186_s8 = sand.u32 (!%p162_p10), 1, %s524_s13  }
  0x10   : > { %205 = vperm.xlu0 (!%p162_p10), %460, %v202_v2   ;;  %s390_s9 = sshll.u32 (!%p162_p10), %s186_s8, 4  ;;  %s402_s10 = sshll.u32 (!%p162_p10), %s532_s15, 8 }
  0x11   : > { %s188_s11 = scalar_lea.vmem (!%p162_p10), [#allocation2], %s390_s9  ;;  %s636_s23 = scalar_lea.hbm (!%p162_p10), %s686_s3, %s402_s10 }
  0x12   : > { %s309_s18 = sshll.u32 (!%p162_p10), %s188_s11, 4  ;;  %s293_s26 = scalar_lea.sflag (!%p162_p10), [#allocation3], %s186_s8  ;;  %s638_s18 = int_to_ptr.vmem [resolvable:$true] %s309_s18 }
  0x13   : > { %s544_s27 = smov (!%p162_p10), [#allocation2]  }
  0x16   : > { %s191_s28 = scalar_select %p190_p11, %s532_s15, 1 }
  0x17   : > { %s462_s15 = scalar_lea.vmem %s638_s18, 256 }
  0x18   : > { %s401_s29 = sshll.u32 %s191_s28, 3  ;;  %p463_p12 = scmp.ne.s32.totalorder %s638_s18, %s462_s15 }
  0x19   : > { %s197_s5 = scalar_lea.vmem %s683_s0, %s401_s29  ;;  %s466_s28 = sshll.u32 %s544_s27, 4  ;;  %s467_s28 = int_to_ptr.vmem [resolvable:$false] %s466_s28 }
  0x1a   : > { %v201_v3 = vld [vmem:[%s197_s5] sm:$0xff]  ;;  %p464_p13 = pnand %p463_p12, %p605_p4  ;;  %s468_s29 = scalar_lea.vmem %s467_s28, 512 }
  0x1b   : > { %v209_v4 = vcombine.high %v201_v3, %v201_v3  ;;  %p469_p1 = scmp.lt.s32.totalorder %s638_s18, %s467_s28  ;;  %p470_p2 = scmp.lt.s32.totalorder %s468_s29, %s462_s15 }
  0x1c   : > { %p465_p0 = pneg %p464_p13 }
  0x1d   : > { %393 = vmatprep.subr.msk.mxu0 %vm214_vm0, %v209_v4  ;;  %p471_p3 = por %p470_p2, %p469_p1 }
  0x1e   : > { %394 = vmatpush1.msk.msra.mxu0 %vm214_vm0, %v201_v3 }
  0x1f   : > { %395 = vmatmul.mubr.msk.f32.vlgmr.msra.gmra.mrb[0].mxu0 %vm210_vm1, %v200_v5  ;;  %p472_p5 = pnand %p471_p3, %p465_p0 }
  0x8f   : > { %v206_v6 = vpop.permute.xlu0 %205 }
  0xf2   : > { %v285_v7 = vpop.f32.mrb[0].mxu0 }
  0xf3   : > { %v286_v8 = vadd.f32 %v285_v7, %v206_v6  ;;  %v287_v9 = vpop.f32.mrb[1].mxu0 }
  0xf4   : > { %v288_v10 = vadd.f32 %v287_v9, %v206_v6 }
  0xf5   : > { %290 = vst [vmem:[%s188_s11] sm:$0xff] %v286_v8 }
  0xf6   : > { %291 = vst [vmem:[%s188_s11 + $0x8] sm:$0xff] %v288_v10 }
  0xf7   : > { %475 = shalt.err (!%p472_p5)
}
  0xf8   : > { %s476_s30 = scalar_lea.hbm %s636_s23, 256  ;;  %s480_s6 = scalar_lea.hbm %s686_s3, 512 }
  0xf9   : > { %p477_p6 = scmp.ne.s32.totalorder %s636_s23, %s476_s30  ;;  %p481_p10 = scmp.lt.u32.totalorder %s636_s23, %s686_s3 }
  0xfa   : > { %p482_p11 = scmp.lt.u32.totalorder %s480_s6, %s476_s30  ;;  %p484_p13 = scmp.lt.u32.totalorder %s476_s30, %s636_s23 }
  0xfb   : > { %p478_p7 = pnand %p477_p6, %p605_p4 }
  0xfc   : > { %p483_p12 = por %p482_p11, %p481_p10 }
  0xfd   : > { %p479_p9 = pneg %p478_p7 }
  0xfe   : > { %p485_p0 = por %p484_p13, %p483_p12 }
 0x100   : > { %p486_p1 = pnand %p485_p0, %p479_p9 }
 0x102   : > { %489 = shalt.err (!%p486_p1)
}
 0x103   : > { %403 = dma.vmem_to_hbm [thread:$0]  (%p605_p4), %s638_s18, 256, %s636_s23, %s293_s26  }
 0x104 PF: > { %p409_p2 = scmp.ge.s32.totalorder %s540_s17, 2  ;;  %s321_s9 = sand.u32 1, %s520_s12  }
 0x105   : > { %s322_s10 = scalar_lea.sflag [#allocation3], %s321_s9 }
 0x106   : > { %p406_p3 = pnand %p409_p2, %p612_p8 }
 0x108   : > { %515 = dma.done.wait (!%p406_p3), %s322_s10, 256  }
 0x109   : > { %517 = vsyncadd (!%p406_p3), %s322_s10, 4294967040  ;;  %s16_s17 = sadd.s32 1, %s540_s17   ;;  %s689_s12 = smov %s524_s13 }
 0x10a   : > { %p13_p5 = scmp.ge.s32.totalorder %s16_s17, 4   ;;  %s690_s13 = smov %s528_s14 }
 0x10b   : > { %s691_s14 = smov %s618_s25  ;;  %s692_s15 = smov %s536_s16 }
 0x10c   : > { %s693_s16 = smov %s695_s20  ;;  %15 = sbr.rel (!%p13_p5) target bundleno = 4 (0x4), region = 67 }
 0x113   :  { %327 = vsyncpa [#allocation3], 1 }
 0x114   :  { %329 = vsyncpa [#allocation3 + $0x1], 1 }

</bundles_post_ra>
